<compile_context>
chip_gen: v7x
topology: tpu7x:2x2x1
jax: 0.10.0
libtpu: 0.0.40
codegen_flags: <defaults>
</compile_context>

<pallas_src>
import jax
import jax.numpy as jnp
from jax.experimental import pallas as pl
from jax.experimental.pallas import tpu as pltpu

BN_EPS = 1e-5
NEG_BIG = 1e30          # finite "-inf" for masked max pooling
LANE = 128


def _round_up(x, m):
    return ((x + m - 1) // m) * m


def _make_kernel(tile_n: int, num_tiles: int):
    def kernel(adj_ref, x_ref, mask_ref,
               w_ref, cb_ref, gamma_ref, beta_ref,
               w1_ref, b1_ref, w2_ref, b2_ref,
               out_ref, h_scratch, hw_scratch):
        l = pl.program_id(0)            # layer axis (sequential)
        t = pl.program_id(1)            # node row-tile axis (sequential: scratch carry)
        n_layers = pl.num_programs(0)

        # ---- first grid step: load padded input features into the resident scratch ----
        @pl.when((l == 0) & (t == 0))
        def _():
            h_scratch[...] = x_ref[...]

        # ---- once per layer (tile 0): feature transform  hW = h @ W_l  (full N x CH) ----
        @pl.when(t == 0)
        def _():
            hw = jnp.dot(h_scratch[...].astype(jnp.bfloat16), w_ref[0],
                         preferred_element_type=jnp.float32)
            hw_scratch[...] = hw.astype(jnp.bfloat16)

        # ---- per row tile: aggregation  h_tile = relu(Â_tile @ hW + b_conv) ----
        # GCNConv bias is applied BEFORE the ReLU (it is not cancelled by BatchNorm
        # because the ReLU is interposed).
        row0 = pl.multiple_of(t * tile_n, tile_n)
        agg = jnp.dot(adj_ref[...], hw_scratch[...],
                      preferred_element_type=jnp.float32)
        h_scratch[pl.ds(row0, tile_n), :] = jnp.maximum(agg + cb_ref[0], 0.0)
        # TODO(synk): F.dropout defaults to training=True (stochastic); identity here
        # (inference semantics).

        # ---- once per layer (last tile): BatchNorm1d over all nodes, two-pass stats ----
        @pl.when(t == num_tiles - 1)
        def _():
            h = h_scratch[...]
            mean = jnp.mean(h, axis=0, keepdims=True)
            d = h - mean
            var = jnp.mean(d * d, axis=0, keepdims=True)   # two-pass: no cancellation
            h_scratch[...] = d * jax.lax.rsqrt(var + BN_EPS) * gamma_ref[0] + beta_ref[0]

        # ---- final grid step: global_max_pool + MLP head + softmax ----
        @pl.when((l == n_layers - 1) & (t == num_tiles - 1))
        def _():
            g = mask_ref.shape[0]
            ch = h_scratch.shape[1]

            # chunked masked running max: never materializes a (G, N, CH) temp.
            # TODO(synk): for very large num_tiles switch to lax.fori_loop + dynamic pl.ds.
            pooled = jnp.full((g, ch), -NEG_BIG, dtype=jnp.float32)
            for i in range(num_tiles):
                rows = h_scratch[i * tile_n:(i + 1) * tile_n, :]       # (tile_n, CH)
                m = mask_ref[:, i * tile_n:(i + 1) * tile_n]           # (G, tile_n)
                cand = jnp.where(m[:, :, None] > 0.0,
                                 rows[None, :, :], -NEG_BIG)           # (G, tile_n, CH)
                pooled = jnp.maximum(pooled, jnp.max(cand, axis=1))
            # empty graphs keep the init sentinel -> zero them so the head stays sane
            pooled = jnp.where(pooled > -0.5 * NEG_BIG, pooled, 0.0)

            y = jnp.dot(pooled.astype(jnp.bfloat16), w1_ref[...],
                        preferred_element_type=jnp.float32) + b1_ref[...]
            y = jnp.maximum(y, 0.0)
            y = jnp.dot(y.astype(jnp.bfloat16), w2_ref[...],
                        preferred_element_type=jnp.float32) + b2_ref[...]
            y = jnp.maximum(y, 0.0)

            # softmax over dim 1 (f32)
            ymax = jnp.max(y, axis=1, keepdims=True)
            e = jnp.exp(y - ymax)
            out_ref[...] = e / jnp.sum(e, axis=1, keepdims=True)

    return kernel


def chemgcn_forward(adj_norm, x, pool_mask, layer_params, head_params, *, tile_n=None):
    """adj_norm: (N,N) f32; x: (N,Fin) f32; pool_mask: (G,N) {0,1} rows;
    layer_params: list of (W, conv_bias, gamma, beta); head_params: (w1,b1,w2,b2)."""
    depth = len(layer_params)
    n = adj_norm.shape[0]
    g = pool_mask.shape[0]
    fin = x.shape[1]
    hid = layer_params[0][0].shape[1]
    w1, b1, w2, b2 = head_params
    h8 = w1.shape[1]
    out_ch = w2.shape[1]

    # lane-dense padded channel width shared by all GCN layers
    ch = _round_up(max(fin, hid), LANE)

    if tile_n is None:
        tile_n = n
        for cand in (512, 256, 128, 64, 32, 16):
            if n % cand == 0:
                tile_n = cand
                break
    assert n % tile_n == 0, (
        "TODO(synk): ragged N needs node padding plus masking of the pad rows out of "
        "the BatchNorm statistics and the max pool")
    assert (tile_n % 16 == 0) or (tile_n == n), \
        "row tile must be a multiple of 16 sublanes (bf16 Â tile) or the full node count"
    num_tiles = n // tile_n

    def pad_cols(a, width, value=0.0):
        pad = width - a.shape[-1]
        if pad <= 0:
            return a
        return jnp.pad(a, [(0, 0)] * (a.ndim - 1) + [(0, pad)], constant_values=value)

    def pad_rows(a, height, value=0.0):
        pad = height - a.shape[0]
        if pad <= 0:
            return a
        return jnp.pad(a, [(0, pad)] + [(0, 0)] * (a.ndim - 1), constant_values=value)

    # bf16 Â for the MXU / halves the streamed bytes.
    adj_bf16 = adj_norm.astype(jnp.bfloat16)
    x_pad = pad_cols(x.astype(jnp.float32), ch)
    mask_f32 = pool_mask.astype(jnp.float32)

    w_all, cb_all, gamma_all, beta_all = [], [], [], []
    for (w, cb, gamma, beta) in layer_params:
        w_all.append(pad_cols(pad_rows(w.astype(jnp.float32), ch), ch).astype(jnp.bfloat16))
        cb_all.append(pad_cols(cb.reshape(1, -1).astype(jnp.float32), ch))
        gamma_all.append(pad_cols(gamma.reshape(1, -1).astype(jnp.float32), ch, 1.0))
        beta_all.append(pad_cols(beta.reshape(1, -1).astype(jnp.float32), ch))
    w_all = jnp.stack(w_all)                 # (depth, CH, CH) bf16
    cb_all = jnp.stack(cb_all)               # (depth, 1, CH) f32
    gamma_all = jnp.stack(gamma_all)         # (depth, 1, CH) f32
    beta_all = jnp.stack(beta_all)           # (depth, 1, CH) f32

    w1_p = pad_rows(w1.astype(jnp.float32), ch).astype(jnp.bfloat16)   # (CH, 8)
    b1_p = b1.reshape(1, -1).astype(jnp.float32)
    w2_p = w2.astype(jnp.bfloat16)                                     # (8, out)
    b2_p = b2.reshape(1, -1).astype(jnp.float32)

    # ---- VMEM budget: generation-aware cap with ~25% headroom ----
    block_bytes = (tile_n * n * 2 + n * ch * 4 + g * n * 4
                   + ch * ch * 2 + 3 * ch * 4
                   + ch * h8 * 2 + h8 * 4 + h8 * out_ch * 2 + out_ch * 4
                   + g * out_ch * 4)
    scratch_bytes = n * ch * 4 + n * ch * 2
    need = 2 * block_bytes + scratch_bytes           # double-buffered blocks + scratch
    try:
        vmem_cap = int(pltpu.get_tpu_info().vmem_capacity_bytes)
    except Exception:
        vmem_cap = 64 * 1024 * 1024                   # conservative (v7x per-TC VMEM)
    vmem_limit = int(min(int(0.75 * vmem_cap), max(16 * 1024 * 1024, 2 * need)))

    # ---- advisory cost estimate for the XLA scheduler ----
    flops = (2 * depth * n * n * ch + 2 * depth * n * ch * ch
             + 2 * g * ch * h8 + 2 * g * h8 * out_ch)
    transcendentals = depth * ch + g * out_ch
    bytes_accessed = (depth * n * n * 2 + n * ch * 4 + g * n * 4
                      + depth * (ch * ch * 2 + 3 * ch * 4)
                      + ch * h8 * 2 + h8 * 4 + h8 * out_ch * 2 + out_ch * 4
                      + g * out_ch * 4)

    kernel = _make_kernel(tile_n, num_tiles)
    full2 = lambda l, t: (0, 0)
    per_layer3 = lambda l, t: (l, 0, 0)

    grid_spec = pltpu.PrefetchScalarGridSpec(
        num_scalar_prefetch=0,
        grid=(depth, num_tiles),
        in_specs=[
            pl.BlockSpec((tile_n, n), lambda l, t: (t, 0)),   # Â row tile (streamed)
            pl.BlockSpec((n, ch), full2),                     # padded x (resident)
            pl.BlockSpec((g, n), full2),                      # pool mask (resident)
            pl.BlockSpec((1, ch, ch), per_layer3),            # W_l
            pl.BlockSpec((1, 1, ch), per_layer3),             # conv bias_l
            pl.BlockSpec((1, 1, ch), per_layer3),             # gamma_l
            pl.BlockSpec((1, 1, ch), per_layer3),             # beta_l
            pl.BlockSpec((ch, h8), full2),                    # head W1 (rows padded)
            pl.BlockSpec((1, h8), full2),                     # head b1
            pl.BlockSpec((h8, out_ch), full2),                # head W2
            pl.BlockSpec((1, out_ch), full2),                 # head b2
        ],
        out_specs=pl.BlockSpec((g, out_ch), full2),
        scratch_shapes=[
            pltpu.VMEM((n, ch), jnp.float32),                 # resident activations h
            pltpu.VMEM((n, ch), jnp.bfloat16),                # hW of the current layer
        ],
    )

    return pl.pallas_call(
        kernel,
        out_shape=jax.ShapeDtypeStruct((g, out_ch), jnp.float32),
        grid_spec=grid_spec,
        compiler_params=pltpu.CompilerParams(
            dimension_semantics=("arbitrary", "arbitrary"),
            vmem_limit_bytes=vmem_limit),
        cost_estimate=pl.CostEstimate(
            flops=int(flops), transcendentals=int(transcendentals),
            bytes_accessed=int(bytes_accessed)),
    )(adj_bf16, x_pad, mask_f32, w_all, cb_all, gamma_all, beta_all,
      w1_p, b1_p, w2_p, b2_p)


def build_norm_adj(src, dst, num_nodes):
    """Dense Â = D^-1/2 (A + I) D^-1/2, matching GCNConv's default normalization."""
    a = jnp.zeros((num_nodes, num_nodes), jnp.float32)
    a = a.at[dst, src].set(1.0)                                # A[target, source]
    idx = jnp.arange(num_nodes)
    a = a.at[idx, idx].set(1.0)                                # add self loops
    deg = jnp.sum(a, axis=1)
    dinv = jax.lax.rsqrt(deg)
    return dinv[:, None] * a * dinv[None, :]


def reference_forward(adj, x, pool_mask, layer_params, head_params):
    """Pure-JAX f32 reference with identical semantics (for validation)."""
    h = x
    for (w, cb, gamma, beta) in layer_params:
        h = adj @ (h @ w) + cb
        h = jnp.maximum(h, 0.0)
        mean = jnp.mean(h, axis=0, keepdims=True)
        var = jnp.mean((h - mean) ** 2, axis=0, keepdims=True)
        h = (h - mean) / jnp.sqrt(var + BN_EPS) * gamma + beta
    masked = jnp.where(pool_mask[:, :, None] > 0, h[None, :, :], -jnp.inf)
    pooled = jnp.max(masked, axis=1)
    pooled = jnp.where(jnp.isfinite(pooled), pooled, 0.0)
    w1, b1, w2, b2 = head_params
    y = jnp.maximum(pooled @ w1 + b1, 0.0)
    y = jnp.maximum(y @ w2 + b2, 0.0)
    return jax.nn.softmax(y, axis=1)


if __name__ == "__main__":
    embedder_depth = 2
    in_channels = 16
    hidden_channels = 32
    out_channels = 8
    num_nodes = 32
    num_graphs = 2
    nodes_per_graph = num_nodes // num_graphs

    key = jax.random.PRNGKey(0)
    keys = jax.random.split(key, 10)

    # node features
    x = jax.random.normal(keys[0], (num_nodes, in_channels), jnp.float32)

    # two ring graphs of 16 nodes each (undirected -> both edge directions)
    src_list, dst_list = [], []
    for gi in range(num_graphs):
        base = gi * nodes_per_graph
        for i in range(nodes_per_graph):
            a, b = base + i, base + (i + 1) % nodes_per_graph
            src_list += [a, b]
            dst_list += [b, a]
    src = jnp.array(src_list, jnp.int32)
    dst = jnp.array(dst_list, jnp.int32)
    adj_norm = build_norm_adj(src, dst, num_nodes)

    # graph assignment and pooling mask as (G, N) one-hot rows
    batch = jnp.concatenate(
        [jnp.full((nodes_per_graph,), gi, jnp.int32) for gi in range(num_graphs)])
    pool_mask = (jnp.arange(num_graphs)[:, None] == batch[None, :]).astype(jnp.float32)

    # deterministic parameters (GCNConv weight + bias, BatchNorm affine, MLP head)
    layer_params = []
    fin = in_channels
    ki = 1
    for i in range(embedder_depth):
        w = 0.2 * jax.random.normal(keys[ki], (fin, hidden_channels), jnp.float32); ki += 1
        cb = 0.05 * jax.random.normal(keys[ki], (hidden_channels,), jnp.float32); ki += 1
        gamma = jnp.ones((hidden_channels,), jnp.float32)
        beta = jnp.zeros((hidden_channels,), jnp.float32)
        layer_params.append((w, cb, gamma, beta))
        fin = hidden_channels

    w1 = 0.2 * jax.random.normal(keys[ki], (hidden_channels, 8), jnp.float32); ki += 1
    b1 = 0.01 * jnp.ones((8,), jnp.float32)
    w2 = 0.2 * jax.random.normal(keys[ki], (8, out_channels), jnp.float32); ki += 1
    b2 = 0.01 * jnp.ones((out_channels,), jnp.float32)
    head_params = (w1, b1, w2, b2)

    out = chemgcn_forward(adj_norm, x, pool_mask, layer_params, head_params, tile_n=16)
    out = jax.block_until_ready(out)

    ref = reference_forward(adj_norm, x, pool_mask, layer_params, head_params)

    assert out.shape == (num_graphs, out_channels)
    assert bool(jnp.all(jnp.isfinite(out)))
    assert bool(jnp.allclose(jnp.sum(out, axis=1), 1.0, atol=1e-5))
    assert bool(jnp.allclose(out, ref, atol=5e-2)), (
        f"max abs diff vs reference: {float(jnp.max(jnp.abs(out - ref)))}")
    print("KERNEL_OK")
</pallas_src>

<mosaic_0001>
module attributes {stable_mosaic.version = 11 : i64} {
  func.func @kernel(%arg0: i32, %arg1: i32, %arg2: memref<16x32xbf16, #tpu.memory_space<vmem>>, %arg3: memref<32x128xf32, #tpu.memory_space<vmem>>, %arg4: memref<2x32xf32, #tpu.memory_space<vmem>>, %arg5: memref<1x128x128xbf16, #tpu.memory_space<vmem>>, %arg6: memref<1x1x128xf32, #tpu.memory_space<vmem>>, %arg7: memref<1x1x128xf32, #tpu.memory_space<vmem>>, %arg8: memref<1x1x128xf32, #tpu.memory_space<vmem>>, %arg9: memref<128x8xbf16, #tpu.memory_space<vmem>>, %arg10: memref<1x8xf32, #tpu.memory_space<vmem>>, %arg11: memref<8x8xbf16, #tpu.memory_space<vmem>>, %arg12: memref<1x8xf32, #tpu.memory_space<vmem>>, %arg13: memref<2x8xf32, #tpu.memory_space<vmem>>, %arg14: memref<32x128xf32, #tpu.memory_space<vmem>>, %arg15: memref<32x128xbf16, #tpu.memory_space<vmem>>) attributes {dimension_semantics = [#tpu.dimension_semantics<arbitrary>, #tpu.dimension_semantics<arbitrary>], iteration_bounds = array<i64: 2, 2>, scalar_prefetch = 0 : i64, scratch_operands = 2 : i64, tpu.core_type = #tpu.core_type<tc>, window_params = [{transform_indices = @transform_0, window_bounds = array<i64: 16, 32>}, {pipeline_mode = #tpu.pipeline_mode<synchronous>, transform_indices = @transform_1, window_bounds = array<i64: 32, 128>}, {pipeline_mode = #tpu.pipeline_mode<synchronous>, transform_indices = @transform_2, window_bounds = array<i64: 2, 32>}, {transform_indices = @transform_3, window_bounds = array<i64: 1, 128, 128>}, {transform_indices = @transform_4, window_bounds = array<i64: 1, 1, 128>}, {transform_indices = @transform_5, window_bounds = array<i64: 1, 1, 128>}, {transform_indices = @transform_6, window_bounds = array<i64: 1, 1, 128>}, {pipeline_mode = #tpu.pipeline_mode<synchronous>, transform_indices = @transform_7, window_bounds = array<i64: 128, 8>}, {pipeline_mode = #tpu.pipeline_mode<synchronous>, transform_indices = @transform_8, window_bounds = array<i64: 1, 8>}, {pipeline_mode = #tpu.pipeline_mode<synchronous>, transform_indices = @transform_9, window_bounds = array<i64: 8, 8>}, {pipeline_mode = #tpu.pipeline_mode<synchronous>, transform_indices = @transform_10, window_bounds = array<i64: 1, 8>}, {pipeline_mode = #tpu.pipeline_mode<synchronous>, transform_indices = @transform_11, window_bounds = array<i64: 2, 8>}]} {
    %c0_i32 = arith.constant 0 : i32
    %0 = arith.cmpi eq, %arg0, %c0_i32 : i32
    %c0_i32_0 = arith.constant 0 : i32
    %1 = arith.cmpi eq, %arg1, %c0_i32_0 : i32
    %2 = arith.andi %0, %1 : i1
    %3 = arith.extui %2 : i1 to i32
    %c0_i32_1 = arith.constant 0 : i32
    %4 = arith.cmpi ne, %3, %c0_i32_1 : i32
    scf.if %4 {
      %c0_16 = arith.constant 0 : index
      %c0_17 = arith.constant 0 : index
      %29 = vector.load %arg3[%c0_16, %c0_17] : memref<32x128xf32, #tpu.memory_space<vmem>>, vector<32x128xf32>
      %c0_18 = arith.constant 0 : index
      %c0_19 = arith.constant 0 : index
      %30 = vector.load %arg14[%c0_18, %c0_19] : memref<32x128xf32, #tpu.memory_space<vmem>>, vector<32x128xf32>
      tpu.vector_store %arg14[%c0_18, %c0_19], %29 {strides = array<i32>} : memref<32x128xf32, #tpu.memory_space<vmem>>, vector<32x128xf32>,
    } else {
    }
    %c0_i32_2 = arith.constant 0 : i32
    %5 = arith.cmpi eq, %arg1, %c0_i32_2 : i32
    %6 = arith.extui %5 : i1 to i32
    %c0_i32_3 = arith.constant 0 : i32
    %7 = arith.cmpi ne, %6, %c0_i32_3 : i32
    scf.if %7 {
      %c0_16 = arith.constant 0 : index
      %c0_17 = arith.constant 0 : index
      %29 = vector.load %arg14[%c0_16, %c0_17] : memref<32x128xf32, #tpu.memory_space<vmem>>, vector<32x128xf32>
      %30 = arith.truncf %29 : vector<32x128xf32> to vector<32x128xbf16>
      %c0_18 = arith.constant 0 : index
      %c0_19 = arith.constant 0 : index
      %c0_20 = arith.constant 0 : index
      %31 = vector.load %arg5[%c0_18, %c0_19, %c0_20] : memref<1x128x128xbf16, #tpu.memory_space<vmem>>, vector<1x128x128xbf16>
      %32 = vector.shape_cast %31 : vector<1x128x128xbf16> to vector<128x128xbf16>
      %cst_21 = arith.constant dense<0.000000e+00> : vector<32x128xf32>
      %33 = tpu.matmul %30, %32, %cst_21 {dimension_numbers = #tpu.dot_dimension_numbers<[1], [0], [0], [1], [0, 0, 1, 1], [], []>} : vector<32x128xbf16>, vector<128x128xbf16>, vector<32x128xf32> -> vector<32x128xf32>
      %34 = arith.truncf %33 : vector<32x128xf32> to vector<32x128xbf16>
      %c0_22 = arith.constant 0 : index
      %c0_23 = arith.constant 0 : index
      %35 = vector.load %arg15[%c0_22, %c0_23] : memref<32x128xbf16, #tpu.memory_space<vmem>>, vector<32x128xbf16>
      tpu.vector_store %arg15[%c0_22, %c0_23], %34 {strides = array<i32>} : memref<32x128xbf16, #tpu.memory_space<vmem>>, vector<32x128xbf16>,
    } else {
    }
    %c16_i32 = arith.constant 16 : i32
    %8 = arith.muli %arg1, %c16_i32 : i32
    %9 = tpu.assume_multiple %8, 16 : i32
    %c0 = arith.constant 0 : index
    %c0_4 = arith.constant 0 : index
    %10 = vector.load %arg2[%c0, %c0_4] : memref<16x32xbf16, #tpu.memory_space<vmem>>, vector<16x32xbf16>
    %c0_5 = arith.constant 0 : index
    %c0_6 = arith.constant 0 : index
    %11 = vector.load %arg15[%c0_5, %c0_6] : memref<32x128xbf16, #tpu.memory_space<vmem>>, vector<32x128xbf16>
    %cst = arith.constant dense<0.000000e+00> : vector<16x128xf32>
    %12 = tpu.matmul %10, %11, %cst {dimension_numbers = #tpu.dot_dimension_numbers<[1], [0], [0], [1], [0, 0, 1, 1], [], []>} : vector<16x32xbf16>, vector<32x128xbf16>, vector<16x128xf32> -> vector<16x128xf32>
    %c0_7 = arith.constant 0 : index
    %c0_8 = arith.constant 0 : index
    %c0_9 = arith.constant 0 : index
    %13 = vector.load %arg6[%c0_7, %c0_8, %c0_9] : memref<1x1x128xf32, #tpu.memory_space<vmem>>, vector<1x1x128xf32>
    %14 = vector.shape_cast %13 : vector<1x1x128xf32> to vector<1x128xf32>
    %15 = vector.broadcast %14 : vector<1x128xf32> to vector<16x128xf32>
    %16 = arith.addf %12, %15 : vector<16x128xf32>
    %cst_10 = arith.constant 0.000000e+00 : f32
    %17 = vector.broadcast %cst_10 : f32 to vector<16x128xf32>
    %18 = arith.maximumf %16, %17 : vector<16x128xf32>
    %19 = arith.index_cast %9 : i32 to index
    %c0_11 = arith.constant 0 : index
    %20 = vector.load %arg14[%19, %c0_11] : memref<32x128xf32, #tpu.memory_space<vmem>>, vector<16x128xf32>
    tpu.vector_store %arg14[%19, %c0_11], %18 {strides = array<i32>} : memref<32x128xf32, #tpu.memory_space<vmem>>, vector<16x128xf32>,
    %c1_i32 = arith.constant 1 : i32
    %21 = arith.cmpi eq, %arg1, %c1_i32 : i32
    %22 = arith.extui %21 : i1 to i32
    %c0_i32_12 = arith.constant 0 : i32
    %23 = arith.cmpi ne, %22, %c0_i32_12 : i32
    scf.if %23 {
      %c0_16 = arith.constant 0 : index
      %c0_17 = arith.constant 0 : index
      %29 = vector.load %arg14[%c0_16, %c0_17] : memref<32x128xf32, #tpu.memory_space<vmem>>, vector<32x128xf32>
      %cst_18 = arith.constant dense<0.000000e+00> : vector<128xf32>
      %30 = vector.multi_reduction <add>, %29, %cst_18 [0] : vector<32x128xf32> to vector<128xf32>
      %31 = vector.shape_cast %30 : vector<128xf32> to vector<1x128xf32>
      %cst_19 = arith.constant 3.200000e+01 : f32
      %32 = vector.broadcast %cst_19 : f32 to vector<1x128xf32>
      %33 = arith.divf %31, %32 : vector<1x128xf32>
      %34 = vector.broadcast %33 : vector<1x128xf32> to vector<32x128xf32>
      %35 = arith.subf %29, %34 : vector<32x128xf32>
      %36 = arith.mulf %35, %35 : vector<32x128xf32>
      %cst_20 = arith.constant dense<0.000000e+00> : vector<128xf32>
      %37 = vector.multi_reduction <add>, %36, %cst_20 [0] : vector<32x128xf32> to vector<128xf32>
      %38 = vector.shape_cast %37 : vector<128xf32> to vector<1x128xf32>
      %cst_21 = arith.constant 3.200000e+01 : f32
      %39 = vector.broadcast %cst_21 : f32 to vector<1x128xf32>
      %40 = arith.divf %38, %39 : vector<1x128xf32>
      %cst_22 = arith.constant 9.99999974E-6 : f32
      %41 = vector.broadcast %cst_22 : f32 to vector<1x128xf32>
      %42 = arith.addf %40, %41 : vector<1x128xf32>
      %43 = math.rsqrt %42 : vector<1x128xf32>
      %44 = vector.broadcast %43 : vector<1x128xf32> to vector<32x128xf32>
      %45 = arith.mulf %35, %44 : vector<32x128xf32>
      %c0_23 = arith.constant 0 : index
      %c0_24 = arith.constant 0 : index
      %c0_25 = arith.constant 0 : index
      %46 = vector.load %arg7[%c0_23, %c0_24, %c0_25] : memref<1x1x128xf32, #tpu.memory_space<vmem>>, vector<1x1x128xf32>
      %47 = vector.shape_cast %46 : vector<1x1x128xf32> to vector<1x128xf32>
      %48 = vector.broadcast %47 : vector<1x128xf32> to vector<32x128xf32>
      %49 = arith.mulf %45, %48 : vector<32x128xf32>
      %c0_26 = arith.constant 0 : index
      %c0_27 = arith.constant 0 : index
      %c0_28 = arith.constant 0 : index
      %50 = vector.load %arg8[%c0_26, %c0_27, %c0_28] : memref<1x1x128xf32, #tpu.memory_space<vmem>>, vector<1x1x128xf32>
      %51 = vector.shape_cast %50 : vector<1x1x128xf32> to vector<1x128xf32>
      %52 = vector.broadcast %51 : vector<1x128xf32> to vector<32x128xf32>
      %53 = arith.addf %49, %52 : vector<32x128xf32>
      %c0_29 = arith.constant 0 : index
      %c0_30 = arith.constant 0 : index
      %54 = vector.load %arg14[%c0_29, %c0_30] : memref<32x128xf32, #tpu.memory_space<vmem>>, vector<32x128xf32>
      tpu.vector_store %arg14[%c0_29, %c0_30], %53 {strides = array<i32>} : memref<32x128xf32, #tpu.memory_space<vmem>>, vector<32x128xf32>,
    } else {
    }
    %c1_i32_13 = arith.constant 1 : i32
    %24 = arith.cmpi eq, %arg0, %c1_i32_13 : i32
    %c1_i32_14 = arith.constant 1 : i32
    %25 = arith.cmpi eq, %arg1, %c1_i32_14 : i32
    %26 = arith.andi %24, %25 : i1
    %27 = arith.extui %26 : i1 to i32
    %c0_i32_15 = arith.constant 0 : i32
    %28 = arith.cmpi ne, %27, %c0_i32_15 : i32
    scf.if %28 {
      %cst_16 = arith.constant -1.000000e+30 : f32
      %29 = vector.broadcast %cst_16 : f32 to vector<2x128xf32>
      %c0_17 = arith.constant 0 : index
      %c0_18 = arith.constant 0 : index
      %30 = vector.load %arg14[%c0_17, %c0_18] : memref<32x128xf32, #tpu.memory_space<vmem>>, vector<16x128xf32>
      %c0_19 = arith.constant 0 : index
      %c0_20 = arith.constant 0 : index
      %31 = vector.load %arg4[%c0_19, %c0_20] : memref<2x32xf32, #tpu.memory_space<vmem>>, vector<2x16xf32>
      %32 = vector.shape_cast %31 : vector<2x16xf32> to vector<2x16x1xf32>
      %cst_21 = arith.constant 0.000000e+00 : f32
      %33 = vector.broadcast %cst_21 : f32 to vector<2x16x1xf32>
      %34 = arith.cmpf ogt, %32, %33 : vector<2x16x1xf32>
      %35 = vector.shape_cast %30 : vector<16x128xf32> to vector<1x16x128xf32>
      %cst_22 = arith.constant -1.000000e+30 : f32
      %36 = vector.shape_cast %34 : vector<2x16x1xi1> to vector<2x16x1xi1>
      %37 = vector.broadcast %36 : vector<2x16x1xi1> to vector<2x16x128xi1>
      %38 = vector.shape_cast %35 : vector<1x16x128xf32> to vector<1x16x128xf32>
      %39 = vector.broadcast %38 : vector<1x16x128xf32> to vector<2x16x128xf32>
      %40 = vector.broadcast %cst_22 : f32 to vector<2x16x128xf32>
      %41 = arith.select %37, %39, %40 : vector<2x16x128xi1>, vector<2x16x128xf32>
      %cst_23 = arith.constant dense<0xFF800000> : vector<2x128xf32>
      %42 = vector.multi_reduction <maximumf>, %41, %cst_23 [1] : vector<2x16x128xf32> to vector<2x128xf32>
      %43 = arith.maximumf %29, %42 : vector<2x128xf32>
      %c16 = arith.constant 16 : index
      %c0_24 = arith.constant 0 : index
      %44 = vector.load %arg14[%c16, %c0_24] : memref<32x128xf32, #tpu.memory_space<vmem>>, vector<16x128xf32>
      %c0_25 = arith.constant 0 : index
      %c16_26 = arith.constant 16 : index
      %45 = vector.load %arg4[%c0_25, %c16_26] : memref<2x32xf32, #tpu.memory_space<vmem>>, vector<2x16xf32>
      %46 = vector.shape_cast %45 : vector<2x16xf32> to vector<2x16x1xf32>
      %cst_27 = arith.constant 0.000000e+00 : f32
      %47 = vector.broadcast %cst_27 : f32 to vector<2x16x1xf32>
      %48 = arith.cmpf ogt, %46, %47 : vector<2x16x1xf32>
      %49 = vector.shape_cast %44 : vector<16x128xf32> to vector<1x16x128xf32>
      %cst_28 = arith.constant -1.000000e+30 : f32
      %50 = vector.shape_cast %48 : vector<2x16x1xi1> to vector<2x16x1xi1>
      %51 = vector.broadcast %50 : vector<2x16x1xi1> to vector<2x16x128xi1>
      %52 = vector.shape_cast %49 : vector<1x16x128xf32> to vector<1x16x128xf32>
      %53 = vector.broadcast %52 : vector<1x16x128xf32> to vector<2x16x128xf32>
      %54 = vector.broadcast %cst_28 : f32 to vector<2x16x128xf32>
      %55 = arith.select %51, %53, %54 : vector<2x16x128xi1>, vector<2x16x128xf32>
      %cst_29 = arith.constant dense<0xFF800000> : vector<2x128xf32>
      %56 = vector.multi_reduction <maximumf>, %55, %cst_29 [1] : vector<2x16x128xf32> to vector<2x128xf32>
      %57 = arith.maximumf %43, %56 : vector<2x128xf32>
      %cst_30 = arith.constant -5.000000e+29 : f32
      %58 = vector.broadcast %cst_30 : f32 to vector<2x128xf32>
      %59 = arith.cmpf ogt, %57, %58 : vector<2x128xf32>
      %cst_31 = arith.constant 0.000000e+00 : f32
      %60 = vector.broadcast %cst_31 : f32 to vector<2x128xf32>
      %61 = arith.select %59, %57, %60 : vector<2x128xi1>, vector<2x128xf32>
      %62 = arith.truncf %61 : vector<2x128xf32> to vector<2x128xbf16>
      %c0_32 = arith.constant 0 : index
      %c0_33 = arith.constant 0 : index
      %63 = vector.load %arg9[%c0_32, %c0_33] : memref<128x8xbf16, #tpu.memory_space<vmem>>, vector<128x8xbf16>
      %cst_34 = arith.constant dense<0.000000e+00> : vector<2x8xf32>
      %64 = tpu.matmul %62, %63, %cst_34 {dimension_numbers = #tpu.dot_dimension_numbers<[1], [0], [0], [1], [0, 0, 1, 1], [], []>} : vector<2x128xbf16>, vector<128x8xbf16>, vector<2x8xf32> -> vector<2x8xf32>
      %c0_35 = arith.constant 0 : index
      %c0_36 = arith.constant 0 : index
      %65 = vector.load %arg10[%c0_35, %c0_36] : memref<1x8xf32, #tpu.memory_space<vmem>>, vector<1x8xf32>
      %66 = vector.broadcast %65 : vector<1x8xf32> to vector<2x8xf32>
      %67 = arith.addf %64, %66 : vector<2x8xf32>
      %cst_37 = arith.constant 0.000000e+00 : f32
      %68 = vector.broadcast %cst_37 : f32 to vector<2x8xf32>
      %69 = arith.maximumf %67, %68 : vector<2x8xf32>
      %70 = arith.truncf %69 : vector<2x8xf32> to vector<2x8xbf16>
      %c0_38 = arith.constant 0 : index
      %c0_39 = arith.constant 0 : index
      %71 = vector.load %arg11[%c0_38, %c0_39] : memref<8x8xbf16, #tpu.memory_space<vmem>>, vector<8x8xbf16>
      %cst_40 = arith.constant dense<0.000000e+00> : vector<2x8xf32>
      %72 = tpu.matmul %70, %71, %cst_40 {dimension_numbers = #tpu.dot_dimension_numbers<[1], [0], [0], [1], [0, 0, 1, 1], [], []>} : vector<2x8xbf16>, vector<8x8xbf16>, vector<2x8xf32> -> vector<2x8xf32>
      %c0_41 = arith.constant 0 : index
      %c0_42 = arith.constant 0 : index
      %73 = vector.load %arg12[%c0_41, %c0_42] : memref<1x8xf32, #tpu.memory_space<vmem>>, vector<1x8xf32>
      %74 = vector.broadcast %73 : vector<1x8xf32> to vector<2x8xf32>
      %75 = arith.addf %72, %74 : vector<2x8xf32>
      %cst_43 = arith.constant 0.000000e+00 : f32
      %76 = vector.broadcast %cst_43 : f32 to vector<2x8xf32>
      %77 = arith.maximumf %75, %76 : vector<2x8xf32>
      %cst_44 = arith.constant dense<0xFF800000> : vector<2xf32>
      %78 = vector.multi_reduction <maximumf>, %77, %cst_44 [1] : vector<2x8xf32> to vector<2xf32>
      %79 = vector.shape_cast %78 : vector<2xf32> to vector<2x1xf32>
      %80 = vector.broadcast %79 : vector<2x1xf32> to vector<2x8xf32>
      %81 = arith.subf %77, %80 : vector<2x8xf32>
      %82 = math.exp %81 : vector<2x8xf32>
      %cst_45 = arith.constant dense<0.000000e+00> : vector<2xf32>
      %83 = vector.multi_reduction <add>, %82, %cst_45 [1] : vector<2x8xf32> to vector<2xf32>
      %84 = vector.shape_cast %83 : vector<2xf32> to vector<2x1xf32>
      %85 = vector.broadcast %84 : vector<2x1xf32> to vector<2x8xf32>
      %86 = arith.divf %82, %85 : vector<2x8xf32>
      %c0_46 = arith.constant 0 : index
      %c0_47 = arith.constant 0 : index
      %87 = vector.load %arg13[%c0_46, %c0_47] : memref<2x8xf32, #tpu.memory_space<vmem>>, vector<2x8xf32>
      tpu.vector_store %arg13[%c0_46, %c0_47], %86 {strides = array<i32>} : memref<2x8xf32, #tpu.memory_space<vmem>>, vector<2x8xf32>,
    } else {
    }
    return
  }
  func.func @transform_0(%arg0: i32, %arg1: i32) -> (i32, i32) {
    %c0_i32 = arith.constant 0 : i32
    %c0_i32_0 = arith.constant 0 : i32
    return %arg1, %c0_i32 : i32, i32
  }
  func.func @transform_1(%arg0: i32, %arg1: i32) -> (i32, i32) {
    %c0_i32 = arith.constant 0 : i32
    %c0_i32_0 = arith.constant 0 : i32
    %c0_i32_1 = arith.constant 0 : i32
    return %c0_i32, %c0_i32_0 : i32, i32
  }
  func.func @transform_2(%arg0: i32, %arg1: i32) -> (i32, i32) {
    %c0_i32 = arith.constant 0 : i32
    %c0_i32_0 = arith.constant 0 : i32
    %c0_i32_1 = arith.constant 0 : i32
    return %c0_i32, %c0_i32_0 : i32, i32
  }
  func.func @transform_3(%arg0: i32, %arg1: i32) -> (i32, i32, i32) {
    %c0_i32 = arith.constant 0 : i32
    %c0_i32_0 = arith.constant 0 : i32
    %c0_i32_1 = arith.constant 0 : i32
    return %arg0, %c0_i32, %c0_i32_0 : i32, i32, i32
  }
  func.func @transform_4(%arg0: i32, %arg1: i32) -> (i32, i32, i32) {
    %c0_i32 = arith.constant 0 : i32
    %c0_i32_0 = arith.constant 0 : i32
    %c0_i32_1 = arith.constant 0 : i32
    return %arg0, %c0_i32, %c0_i32_0 : i32, i32, i32
  }
  func.func @transform_5(%arg0: i32, %arg1: i32) -> (i32, i32, i32) {
    %c0_i32 = arith.constant 0 : i32
    %c0_i32_0 = arith.constant 0 : i32
    %c0_i32_1 = arith.constant 0 : i32
    return %arg0, %c0_i32, %c0_i32_0 : i32, i32, i32
  }
  func.func @transform_6(%arg0: i32, %arg1: i32) -> (i32, i32, i32) {
    %c0_i32 = arith.constant 0 : i32
    %c0_i32_0 = arith.constant 0 : i32
    %c0_i32_1 = arith.constant 0 : i32
    return %arg0, %c0_i32, %c0_i32_0 : i32, i32, i32
  }
  func.func @transform_7(%arg0: i32, %arg1: i32) -> (i32, i32) {
    %c0_i32 = arith.constant 0 : i32
    %c0_i32_0 = arith.constant 0 : i32
    %c0_i32_1 = arith.constant 0 : i32
    return %c0_i32, %c0_i32_0 : i32, i32
  }
  func.func @transform_8(%arg0: i32, %arg1: i32) -> (i32, i32) {
    %c0_i32 = arith.constant 0 : i32
    %c0_i32_0 = arith.constant 0 : i32
    %c0_i32_1 = arith.constant 0 : i32
    return %c0_i32, %c0_i32_0 : i32, i32
  }
  func.func @transform_9(%arg0: i32, %arg1: i32) -> (i32, i32) {
    %c0_i32 = arith.constant 0 : i32
    %c0_i32_0 = arith.constant 0 : i32
    %c0_i32_1 = arith.constant 0 : i32
    return %c0_i32, %c0_i32_0 : i32, i32
  }
  func.func @transform_10(%arg0: i32, %arg1: i32) -> (i32, i32) {
    %c0_i32 = arith.constant 0 : i32
    %c0_i32_0 = arith.constant 0 : i32
    %c0_i32_1 = arith.constant 0 : i32
    return %c0_i32, %c0_i32_0 : i32, i32
  }
  func.func @transform_11(%arg0: i32, %arg1: i32) -> (i32, i32) {
    %c0_i32 = arith.constant 0 : i32
    %c0_i32_0 = arith.constant 0 : i32
    %c0_i32_1 = arith.constant 0 : i32
    return %c0_i32, %c0_i32_0 : i32, i32
  }
}

</mosaic_0001>

<bundles_post_ra>
// kernel: tpu_custom_call.1
= control target key start
LH: loop header
LB: loop body
LE: loop exit
PB: predicated region body
PF: predicated region fallthrough
CT: control target
= control target key end

     0   :  { %s1865_s0 = inlined_call_operand.vmem [shape: bf16[32,32], index: 0, kind: input, shape index: {}]   ;;  %s1866_s1 = inlined_call_operand.vmem [shape: f32[32,128], index: 1, kind: input, shape index: {}]   ;;  %s1867_s2 = inlined_call_operand.vmem [shape: f32[2,32], index: 2, kind: input, shape index: {}]   ;;  %s1868_s3 = inlined_call_operand.hbm [shape: bf16[2,128,128], index: 3, kind: input, shape index: {}]   ;;  %s1869_s4 = inlined_call_operand.vmem [shape: f32[2,1,128], index: 4, kind: input, shape index: {}]   ;;  %s1870_s5 = inlined_call_operand.vmem [shape: f32[2,1,128], index: 5, kind: input, shape index: {}]   ;;  %s1871_s6 = inlined_call_operand.vmem [shape: f32[2,1,128], index: 6, kind: input, shape index: {}]   ;;  %s1872_s7 = inlined_call_operand.vmem [shape: bf16[128,8], index: 7, kind: input, shape index: {}]   ;;  %s1873_s8 = inlined_call_operand.vmem [shape: f32[1,8], index: 8, kind: input, shape index: {}]   ;;  %s1874_s9 = inlined_call_operand.vmem [shape: bf16[8,8], index: 9, kind: input, shape index: {}]   ;;  %s1875_s10 = inlined_call_operand.vmem [shape: f32[1,8], index: 10, kind: input, shape index: {}]   ;;  %s1876_s11 = inlined_call_operand.hbm [shape: f32[2,8], index: 11, kind: output, shape index: {}]  }
   0x1   :  { %1883 = sst [smem:[#allocation16_spill]] %s1868_s3 }
   0x2   :  { %1884 = sst [smem:[#allocation17_spill]] %s1876_s11 }
   0x3   :  { %16 = vsyncpa [#allocation5], 0 }
   0x4   :  { %18 = vsyncpa [#allocation5 + $0x1], 0 }
   0x5   :  { %19 = vsyncpa [#allocation6], 0  ;;  %s1588_s17 = smov 0   ;;  %s1590_s18 = smov 0  }
   0x6   :  { %s1592_s19 = smov 0   ;;  %s1594_s20 = smov 0  }
   0x7   :  { %s1596_s21 = smov 0   ;;  %s1598_s22 = smov 0  }
   0x8   :  { %s1600_s23 = smov 0   ;;  %s1602_s24 = smov 0  }
   0x9 LB: > { %1885 = sst [smem:[#allocation10_spill]] %s1498_s19  ;;  %s1877_s25 = sadd.s32 4294967295, %s1518_s24   ;;  %s1518_s24 = sphi %s1602_s24, %s25_s24   ;;  %s1514_s23 = sphi %s1600_s23, %s1904_s23   ;;  %s1510_s22 = sphi %s1598_s22, %s1903_s22   ;;  %s1506_s21 = sphi %s1596_s21, %s1902_s21   ;;  %s1502_s20 = sphi %s1594_s20, %s1901_s20   ;;  %s1498_s19 = sphi %s1592_s19, %s1900_s19   ;;  %s1494_s18 = sphi %s1590_s18, %s1906_s18   ;;  %s1490_s17 = sphi %s1588_s17, %s1905_s17  }
   0xa   : > { %1886 = sst [smem:[#allocation11_spill]] %s1510_s22  ;;  %s34_s26 = sadd.s32 1, %s1510_s22 }
   0xb   : > { %1887 = sst [smem:[#allocation12_spill]] %s1514_s23  ;;  %p35_p0 = scmp.ge.s32.totalorder %s34_s26, 2 }
   0xc   : > { %s37_s27 = sadd.s32 1, %s1514_s23  ;;  %s112_s28 = sadd.s32 1, %s1498_s19 }
   0xd   : > { %p119_p1 = scmp.ne.s32.totalorder %s1498_s19, %s1494_s18  ;;  %s1908_s26 = smov (%p35_p0, %s34_s26), 0 }
   0xe   : > { %1888 = sst [smem:[#allocation13_spill]] %s1908_s26  ;;  %s1910_s27 = smov (!%p35_p0, %s37_s27), %s1514_s23 }
   0xf   : > { %p120_p2 = scmp.eq.s32.totalorder %s1518_s24, 0  ;;  %p125_p3 = scmp.ne.s32.totalorder %s1494_s18, %s1490_s17 }
  0x10   : > { %p39_p4 = scmp.ge.s32.totalorder %s1910_s27, 2  ;;  %p126_p5 = scmp.eq.s32.totalorder %s1877_s25, 0 }
  0x11   : > { %p1639_p6 = por %p120_p2, %p119_p1  ;;  %p1295_p8 = scmp.lt.s32.totalorder %s1518_s24, 4 }
  0x12   : > { %s1912_s27 = smov (%p39_p4, %s1910_s27), 0  ;;  %p1645_p7 = por %p126_p5, %p125_p3 }
  0x13   : > { %1890 = sst [smem:[#allocation14_spill]] %s1912_s27  ;;  %s109_s12 = ssub.s32 %s1514_s23, %s1912_s27 }
  0x14   : > { %s359_s13 = sand.u32 1, %s1498_s19   ;;  %p110_p9 = scmp.eq.s32.totalorder %s109_s12, 0 }
  0x15   : > { %s1168_s14 = sshll.u32 %s359_s13, 6  ;;  %s1206_s15 = sshll.u32 %s1514_s23, 10 }
  0x16   : > { %s1655_s16 = scalar_select %p110_p9, %s1498_s19, %s112_s28  }
  0x17   : > { %s1893_s3 = sld [smem:[#allocation16_spill]]  ;;  %s363_s22 = scalar_lea.vmem [#allocation4], %s1168_s14 }
  0x18   : > { %1892 = sst [smem:[#allocation15_spill]] %s1655_s16  ;;  %s370_s11 = sshll.u32 %s363_s22, 4  ;;  %s1668_s11 = int_to_ptr.vmem [resolvable:$true] %s370_s11 }
  0x19   : > { %p1664_p10 = pnand %p1295_p8, %p1639_p6  ;;  %s1670_s28 = scalar_lea.sflag [#allocation5], %s359_s13 }
  0x1b   : > { %p1394_p12 = pneg %p1664_p10 }
  0x1d   : > { %s1660_s26 = scalar_lea.hbm %s1893_s3, %s1206_s15  ;;  %s1397_s12 = scalar_lea.hbm %s1893_s3, 2048 }
  0x1e   : > { %s1392_s25 = scalar_lea.hbm %s1660_s26, 1024  ;;  %p1398_p1 = scmp.lt.u32.totalorder %s1660_s26, %s1893_s3 }
  0x1f   : > { %p1393_p11 = scmp.ne.s32.totalorder %s1660_s26, %s1392_s25  ;;  %p1399_p2 = scmp.lt.u32.totalorder %s1397_s12, %s1392_s25 }
  0x20   : > { %p1401_p4 = scmp.lt.u32.totalorder %s1392_s25, %s1660_s26 }
  0x21   : > { %p1395_p13 = pnand %p1394_p12, %p1393_p11  ;;  %p1400_p3 = por %p1399_p2, %p1398_p1 }
  0x23   : > { %p1396_p0 = pneg %p1395_p13  ;;  %p1402_p5 = por %p1401_p4, %p1400_p3 }
  0x25   : > { %p1403_p6 = pnand %p1402_p5, %p1396_p0 }
  0x27   : > { %1406 = shalt.err (!%p1403_p6)
}
  0x28   : > { %s1407_s13 = scalar_lea.vmem %s1668_s11, 1024  ;;  %s1520_s17 = smov [#allocation4]  }
  0x29   : > { %p1408_p8 = scmp.ne.s32.totalorder %s1668_s11, %s1407_s13  ;;  %s1412_s22 = sshll.u32 %s1520_s17, 4  ;;  %s1413_s22 = int_to_ptr.vmem [resolvable:$false] %s1412_s22 }
  0x2a   : > { %s1414_s29 = scalar_lea.vmem %s1413_s22, 2048  ;;  %p1415_p13 = scmp.lt.s32.totalorder %s1668_s11, %s1413_s22 }
  0x2b   : > { %p1410_p9 = pnand %p1408_p8, %p1394_p12  ;;  %p1416_p1 = scmp.lt.s32.totalorder %s1414_s29, %s1407_s13 }
  0x2d   : > { %p1411_p11 = pneg %p1410_p9  ;;  %p1417_p2 = por %p1416_p1, %p1415_p13 }
  0x2f   : > { %p1418_p3 = pnand %p1417_p2, %p1411_p11 }
  0x31   : > { %1421 = shalt.err (!%p1418_p3)
}
  0x32   : > { %s1521_s25 = smov 64   ;;  %s1522_s12 = smov 4  }
  0x33   : > { %1294 = dma.hbm_to_vmem [thread:$0]  (!%p1664_p10), %s1660_s26, 1024, %s1668_s11, %s1670_s28, %s1521_s25, %s1521_s25, %s1522_s12  }
  0x34   : > { %p1171_p12 = scmp.ge.s32.totalorder %s1518_s24, 1  ;;  %p396_p0 = scmp.lt.s32.totalorder %s1518_s24, 5 }
  0x36   : > { %p397_p4 = pnand %p1171_p12, %p396_p0 }
  0x37   : > { %s402_s14 = sand.u32 (!%p397_p4), 1, %s1494_s18  }
  0x38   : > { %400 = sbr.rel (%p397_p4) target bundleno = 1582 (0x62e), region = 64  ;;  %s1172_s15 = sshll.u32 (!%p397_p4), %s402_s14, 6 }
  0x39   : > { %s403_s13 = scalar_lea.sflag (!%p397_p4), [#allocation5], %s402_s14  ;;  %s1701_s17 = scalar_lea.vmem (!%p397_p4), [#allocation4], %s1172_s15 }
  0x3f   : > { %1481 = dma.done.wait (%p1645_p7), %s403_s13, 1024  }
  0x40   : > { %1483 = vsyncadd (%p1645_p7), %s403_s13, 4294966272  ;;  %s1173_s11 = sshll.u32 %s1502_s20, 1  ;;  %p460_p10 = scmp.lt.s32.totalorder %s1506_s21, 1 }
  0x41   : > { %p455_p5 = scmp.lt.s32.totalorder %s1173_s11, 3  ;;  %p470_p6 = scmp.eq.s32.totalorder %s1506_s21, 0 }
  0x42   : > { %s1711_s26 = scalar_select %p460_p10, %s1506_s21, 1 }
  0x43   : > { %s1914_s11 = smov (!%p455_p5, %s1173_s11), 3  ;;  %p471_p7 = scmp.eq.s32.totalorder %s1502_s20, 0 }
  0x44   : > { %s462_s30 = scalar_lea.vmem %s1869_s4, %s1711_s26  ;;  %s465_s25 = scalar_lea.vmem %s1870_s5, %s1711_s26 }
  0x45   : > { %s1174_s12 = sshll.u32 %s1914_s11, 2  ;;  %s468_s13 = scalar_lea.vmem %s1871_s6, %s1711_s26 }
  0x46   : > { %s1728_s16 = scalar_lea.vmem %s1865_s0, %s1174_s12  ;;  %p472_p8 = pnand %p471_p7, %p470_p6 }
  0x47   : > { %v476_v0 = vld [vmem:[%s1866_s1] sm:$0xff] (!%p472_p8)  ;;  %v477_v1 = vld [vmem:[%s1866_s1 + $0x8] sm:$0xff] (!%p472_p8)  ;;  %v478_v2 = vld [vmem:[%s1866_s1 + $0x10] sm:$0xff] (!%p472_p8) }
  0x48   : > { %475 = sbr.rel (%p472_p8) target bundleno = 79 (0x4f), region = 72  ;;  %480 = vst [vmem:[#allocation2] sm:$0xff] (!%p472_p8), %v476_v0  ;;  %481 = vst [vmem:[#allocation2 + $0x8] sm:$0xff] (!%p472_p8), %v477_v1  ;;  %v479_v3 = vld [vmem:[%s1866_s1 + $0x18] sm:$0xff] (!%p472_p8) }
  0x49   : > { %482 = vst [vmem:[#allocation2 + $0x10] sm:$0xff] (!%p472_p8), %v478_v2  ;;  %483 = vst [vmem:[#allocation2 + $0x18] sm:$0xff] (!%p472_p8), %v479_v3 }
  0x4f PF: > { %p1175_p9 = scmp.ne.s32.totalorder %s1502_s20, 0 }
  0x50   : > { %v1369_v4 = vld [vmem:[%s1701_s17] sm:$0xff] (!%p1175_p9)   ;;  %v1370_v5 = vld [vmem:[%s1701_s17 + $0x8] sm:$0xff] (!%p1175_p9)   ;;  %v1371_v6 = vld [vmem:[%s1701_s17 + $0x10] sm:$0xff] (!%p1175_p9)  }
  0x51   : > { %486 = sbr.rel (%p1175_p9) target bundleno = 331 (0x14b), region = 76  ;;  %1231 = vmatprep.subr.bf16.mxu0 (!%p1175_p9), %v1369_v4  ;;  %v1372_v7 = vld [vmem:[%s1701_s17 + $0x18] sm:$0xff] (!%p1175_p9)   ;;  %v487_v8 = vld [vmem:[#allocation2] sm:$0xff] (!%p1175_p9)  ;;  %v1373_v11 = vld [vmem:[%s1701_s17 + $0x20] sm:$0xff] (!%p1175_p9)  }
  0x52   : > { %1232 = vmatpush3.bf16.msra.mxu0 (!%p1175_p9), %v1369_v4  ;;  %v488_v9 = vld [vmem:[#allocation2 + $0x8] sm:$0xff] (!%p1175_p9)  ;;  %v1374_v12 = vld [vmem:[%s1701_s17 + $0x28] sm:$0xff] (!%p1175_p9)   ;;  %v1375_v13 = vld [vmem:[%s1701_s17 + $0x30] sm:$0xff] (!%p1175_p9)  }
  0x53   : > { %1233 = vmatprep.subr.bf16.mxu0 (!%p1175_p9), %v1370_v5  ;;  %v491_v10 = vpack.c.bf16 (!%p1175_p9), %v488_v9, %v487_v8  ;;  %v1376_v14 = vld [vmem:[%s1701_s17 + $0x38] sm:$0xff] (!%p1175_p9)   ;;  %v489_v15 = vld [vmem:[#allocation2 + $0x10] sm:$0xff] (!%p1175_p9)  ;;  %v490_v16 = vld [vmem:[#allocation2 + $0x18] sm:$0xff] (!%p1175_p9) }
  0x54   : > { %v492_v17 = vpack.c.bf16 (!%p1175_p9), %v490_v16, %v489_v15 }
  0x55   : > { %1247 = vmatprep.mubr.bf16.mxu0 (!%p1175_p9), %v491_v10 }
  0x56   : > { %1234 = vmatpush3.bf16.msra.mxu0 (!%p1175_p9), %v1370_v5 }
  0x57   : > { %1235 = vmatprep.subr.bf16.mxu0 (!%p1175_p9), %v1371_v6 }
  0x5a   : > { %1236 = vmatpush3.bf16.msra.mxu0 %v1371_v6 }
  0x5b   : > { %1237 = vmatprep.subr.bf16.mxu0 %v1372_v7 }
  0x5e   : > { %1238 = vmatpush3.bf16.msra.mxu0 %v1372_v7 }
  0x5f   : > { %1239 = vmatprep.subr.bf16.mxu0 %v1373_v11 }
  0x62   : > { %1240 = vmatpush3.bf16.msra.mxu0 %v1373_v11 }
  0x63   : > { %1241 = vmatprep.subr.bf16.mxu0 %v1374_v12 }
  0x66   : > { %1242 = vmatpush3.bf16.msra.mxu0 %v1374_v12 }
  0x67   : > { %1243 = vmatprep.subr.bf16.mxu0 %v1375_v13 }
  0x6a   : > { %1244 = vmatpush3.bf16.msra.mxu0 %v1375_v13 }
  0x6b   : > { %1245 = vmatprep.subr.bf16.mxu0 %v1376_v14 }
  0x6e   : > { %1246 = vmatpush3.bf16.msra.mxu0 %v1376_v14 }
  0x71   : > { %1248 = vmatmul.mubr.bf16.vlgmr.msra.gmra.mrb[0].mxu0 %v492_v17 }
 0x144   : > { %v1249_v18 = vpop.f32.mrb[0].mxu0 }
 0x145   : > { %v591_v19 = vpop.f32.mrb[1].mxu0 }
 0x146   : > { %v1250_v20 = vpop.f32.mrb[2].mxu0 }
 0x147   : > { %v607_v21 = vpack.c.bf16 %v1250_v20, %v1249_v18  ;;  %v594_v22 = vpop.f32.mrb[3].mxu0 }
 0x148   : > { %v606_v23 = vpack.c.bf16 %v594_v22, %v591_v19 }
 0x149   : > { %609 = vst [vmem:[#allocation3 + $0x8] sm:$0xff] %v607_v21 }
 0x14a   : > { %608 = vst [vmem:[#allocation3] sm:$0xff] %v606_v23 }
 0x14b PF: > { %v1523_v25 = vmov 0.0   ;;  %vm1524_vm0 = vmmov 0   ;;  %v1377_v27 = vld [vmem:[%s1728_s16] sm:$0xff]   ;;  %vm627_vm1 = vcmask 261120   ;;  %p677_p11 = scmp.eq.s32.totalorder %s1502_s20, 1  ;;  %s1184_s12 = sshll.u32 %s1502_s20, 4 }
 0x14c   : > { %1251 = vmatprep.subr.bf16.mxu0 %v1523_v25  ;;  %1255 = vmatprep.mubr.msk.bf16.mxu0 %vm1524_vm0, %v1523_v25  ;;  %v1185_v28 = vld [vmem:[%s462_s30] ss:$0 sm:$0xff]  ;;  %s674_s14 = scalar_lea.vmem [#allocation2], %s1184_s12  ;;  %p1188_p13 = scmp.ne.s32.totalorder %s1502_s20, 1 }
 0x14d   : > { %v1189_v7 = vld [vmem:[%s465_s25] ss:$0 sm:$0xff] (!%p1188_p13) }
 0x14e   : > { %v1190_v12 = vld [vmem:[%s468_s13] ss:$0 sm:$0xff] (!%p1188_p13) }
 0x150   : > { %v614_v26 = vld [vmem:[#allocation3 + $0x8] sm:$0xff] }
 0x151   : > { %v613_v24 = vld [vmem:[#allocation3] sm:$0xff] }
 0x152   : > { %1252 = vmatpush3.bf16.msra.mxu0 %v613_v24 }
 0x153   : > { %1253 = vmatprep.subr.bf16.mxu0 %v1523_v25 }
 0x156   : > { %1254 = vmatpush3.bf16.msra.mxu0 %v614_v26 }
 0x159   : > { %1256 = vmatmul.mubr.msk.bf16.vlgmr.msra.gmra.mrb[0].mxu0 %vm627_vm1, %v1377_v27 }
 0x22c   : > { %v665_v29 = vpop.f32.mrb[0].mxu0 }
 0x22d   : > { %v666_v30 = vadd.f32 %v1185_v28, %v665_v29  ;;  %v1257_v31 = vpop.f32.mrb[1].mxu0  ;;  %680 = sbr.rel (%p1188_p13) target bundleno = 636 (0x27c), region = 80 }
 0x22e   : > { %v668_v32 = vpop.f32.mrb[2].mxu0 }
 0x22f   : > { %v672_v33 = vmax.f32 %v666_v30, 0.0  ;;  %v669_v34 = vadd.f32 %v1185_v28, %v668_v32  ;;  %v1258_v35 = vpop.f32.mrb[3].mxu0 }
 0x231   : > { %675 = vst [vmem:[%s674_s14] sm:$0xff] %v672_v33  ;;  %v673_v36 = vmax.f32 %v669_v34, 0.0 }
 0x233   : > { %676 = vst [vmem:[%s674_s14 + $0x8] sm:$0xff] %v673_v36 }
 0x23a   : > { %v681_v37 = vld [vmem:[#allocation2] sm:$0xff]  ;;  %v682_v38 = vld [vmem:[#allocation2 + $0x8] sm:$0xff]  ;;  %v683_v39 = vld [vmem:[#allocation2 + $0x10] sm:$0xff] }
 0x23b   : > { %v685_v40 = vadd.f32 %v682_v38, %v681_v37  ;;  %v684_v41 = vld [vmem:[#allocation2 + $0x18] sm:$0xff] }
 0x23d   : > { %v686_v42 = vadd.f32 %v685_v40, %v683_v39 }
 0x23f   : > { %v687_v43 = vadd.f32 %v686_v42, %v684_v41 }
 0x241   : > { %v688_v44 = vrot.slane %v687_v43, 4 }
 0x243   : > { %v689_v45 = vadd.f32 %v688_v44, %v687_v43 }
 0x245   : > { %v690_v46 = vrot.slane %v689_v45, 2 }
 0x247   : > { %v691_v47 = vadd.f32 %v690_v46, %v689_v45 }
 0x249   : > { %v692_v48 = vrot.slane %v691_v47, 1 }
 0x24b   : > { %v693_v49 = vadd.f32 %v692_v48, %v691_v47 }
 0x24d   : > { %v695_v50 = vmul.f32 0.03125, %v693_v49 }
 0x24f   : > { %v696_v51 = vsub.f32 %v681_v37, %v695_v50  ;;  %v697_v52 = vsub.f32 %v682_v38, %v695_v50  ;;  %v698_v53 = vsub.f32 %v683_v39, %v695_v50  ;;  %v699_v54 = vsub.f32 %v684_v41, %v695_v50 }
 0x251   : > { %v700_v55 = vmul.f32 %v696_v51, %v696_v51  ;;  %v701_v56 = vmul.f32 %v697_v52, %v697_v52  ;;  %v702_v57 = vmul.f32 %v698_v53, %v698_v53  ;;  %v703_v58 = vmul.f32 %v699_v54, %v699_v54 }
 0x253   : > { %v704_v59 = vadd.f32 %v701_v56, %v700_v55 }
 0x255   : > { %v705_v60 = vadd.f32 %v704_v59, %v702_v57 }
 0x257   : > { %v706_v61 = vadd.f32 %v705_v60, %v703_v58 }
 0x259   : > { %v707_v62 = vrot.slane %v706_v61, 4 }
 0x25b   : > { %v708_v63 = vadd.f32 %v707_v62, %v706_v61 }
 0x25d   : > { %v709_v0 = vrot.slane %v708_v63, 2 }
 0x25f   : > { %v710_v1 = vadd.f32 %v709_v0, %v708_v63 }
 0x261   : > { %v711_v2 = vrot.slane %v710_v1, 1 }
 0x263   : > { %v712_v3 = vadd.f32 %v711_v2, %v710_v1 }
 0x265   : > { %v713_v4 = vmul.f32 0.03125, %v712_v3 }
 0x267   : > { %v714_v5 = vadd.f32 1e-05, %v713_v4 }
 0x269   : > { %1378 = vrsqrt.f32 %v714_v5 }
 0x273   : > { %v1379_v6 = vpop.eup %1378 }
 0x274   : > { %v716_v8 = vmul.f32 %v1379_v6, %v696_v51  ;;  %v717_v9 = vmul.f32 %v1379_v6, %v697_v52  ;;  %v718_v10 = vmul.f32 %v1379_v6, %v698_v53  ;;  %v719_v11 = vmul.f32 %v1379_v6, %v699_v54 }
 0x276   : > { %v727_v13 = vmul.f32 %v1189_v7, %v716_v8  ;;  %v728_v14 = vmul.f32 %v1189_v7, %v717_v9  ;;  %v729_v15 = vmul.f32 %v1189_v7, %v718_v10  ;;  %v730_v16 = vmul.f32 %v1189_v7, %v719_v11 }
 0x278   : > { %v738_v17 = vadd.f32 %v1190_v12, %v727_v13  ;;  %v739_v18 = vadd.f32 %v1190_v12, %v728_v14  ;;  %v740_v19 = vadd.f32 %v1190_v12, %v729_v15  ;;  %v741_v20 = vadd.f32 %v1190_v12, %v730_v16 }
 0x27a   : > { %742 = vst [vmem:[#allocation2] sm:$0xff] %v738_v17  ;;  %743 = vst [vmem:[#allocation2 + $0x8] sm:$0xff] %v739_v18 }
 0x27b   : > { %744 = vst [vmem:[#allocation2 + $0x10] sm:$0xff] %v740_v19  ;;  %745 = vst [vmem:[#allocation2 + $0x18] sm:$0xff] %v741_v20 }
 0x27c PF: > { %p746_p1 = scmp.eq.s32.totalorder %s1506_s21, 1 }
 0x27e   : > { %p747_p2 = pnand %p746_p1, %p677_p11 }
 0x27f   : > { %v754_v21 = vlaneseq (!%p747_p2)  ;;  %v1380_v22 = vld [vmem:[%s1872_s7] sm:$0xff] (!%p747_p2)   ;;  %v1525_v24 = vmov (!%p747_p2), 0.0   ;;  %v1381_v30 = vld [vmem:[%s1872_s7 + $0x8] sm:$0xff] (!%p747_p2)   ;;  %v1382_v31 = vld [vmem:[%s1872_s7 + $0x10] sm:$0xff] (!%p747_p2)   ;;  %vm1526_vm2 = vmmov (!%p747_p2), 0   ;;  %vm891_vm13 = vcmask (!%p747_p2), 1041409  }
 0x280   : > { %750 = sbr.rel (%p747_p2) target bundleno = 1551 (0x60f), region = 84  ;;  %1259 = vmatprep.subr.bf16.mxu0 (!%p747_p2), %v1525_v24  ;;  %1279 = vmatprep.subr.bf16.mxu1 (!%p747_p2), %v1525_v24  ;;  %v753_v25 = vld [vmem:[%s1867_s2] sm:$0x3] (!%p747_p2)  ;;  %v1383_v32 = vld [vmem:[%s1872_s7 + $0x18] sm:$0xff] (!%p747_p2)   ;;  %v1385_v34 = vld [vmem:[%s1872_s7 + $0x28] sm:$0xff] (!%p747_p2)   ;;  %vm997_vm14 = vcmask (!%p747_p2), 1043456  }
 0x281   : > { %v755_v23 = vshrl.u32 (!%p747_p2), %v754_v21, 7  ;;  %1260 = vmatpush3.bf16.msra.mxu0 (!%p747_p2), %v1380_v22  ;;  %v1384_v33 = vld [vmem:[%s1872_s7 + $0x20] sm:$0xff] (!%p747_p2)   ;;  %v1386_v35 = vld [vmem:[%s1872_s7 + $0x30] sm:$0xff] (!%p747_p2)   ;;  %1275 = vmatprep.mubr.msk.bf16.mxu0 (!%p747_p2), %vm1526_vm2, %v1525_v24  ;;  %v1387_v36 = vld [vmem:[%s1872_s7 + $0x38] sm:$0xff] (!%p747_p2)   ;;  %vm993_vm15 = vcmask (!%p747_p2), 64512   ;;  %vm1042_vm0 = vcmask (!%p747_p2), 58368  }
 0x282   : > { %1261 = vmatprep.subr.bf16.mxu0 (!%p747_p2), %v1525_v24  ;;  %1281 = vmatprep.mubr.msk.bf16.mxu1 (!%p747_p2), %vm1526_vm2, %v1525_v24  ;;  %v751_v39 = vld [vmem:[#allocation2] sm:$0xff] (!%p747_p2)  ;;  %v752_v40 = vld [vmem:[#allocation2 + $0x8] sm:$0xff] (!%p747_p2)  ;;  %v809_v49 = vld [vmem:[#allocation2 + $0x18] sm:$0xff] (!%p747_p2) }
 0x283   : > { %v767_v26 = vsub.s32 (!%p747_p2), 1, %v755_v23  ;;  %v756_v27 = vsub.s32 (!%p747_p2), 0, %v755_v23  ;;  %v808_v50 = vld [vmem:[#allocation2 + $0x10] sm:$0xff] (!%p747_p2) }
 0x285   : > { %v768_v28 = vrot.slane (!%p747_p2), %v753_v25, %v767_v26  ;;  %v757_v29 = vrot.slane (!%p747_p2), %v753_v25, %v756_v27  ;;  %1262 = vmatpush3.bf16.msra.mxu0 (!%p747_p2), %v1381_v30 }
 0x286   : > { %1263 = vmatprep.subr.bf16.mxu0 (!%p747_p2), %v1525_v24 }
 0x287   : > { %770 = vbcast.lane.b32.xlu1 %v768_v28, 256  ;;  %759 = vbcast.lane.b32.xlu0 %v757_v29, 256 }
 0x289   : > { %1264 = vmatpush3.bf16.msra.mxu0 %v1382_v31 }
 0x28a   : > { %1265 = vmatprep.subr.bf16.mxu0 %v1525_v24 }
 0x28b   : > { %774 = vbcast.lane.b32.xlu1 %v768_v28, 264  ;;  %763 = vbcast.lane.b32.xlu0 %v757_v29, 264 }
 0x28d   : > { %1266 = vmatpush3.bf16.msra.mxu0 %v1383_v32 }
 0x28e   : > { %1267 = vmatprep.subr.bf16.mxu0 %v1525_v24 }
 0x28f   : > { %816 = vbcast.lane.b32.xlu1 %v757_v29, 280  ;;  %812 = vbcast.lane.b32.xlu0 %v757_v29, 272 }
 0x291   : > { %1268 = vmatpush3.bf16.msra.mxu0 %v1384_v33  ;;  %v985_v33 = vld [vmem:[%s1874_s9] sm:$0xf] }
 0x292   : > { %1269 = vmatprep.subr.bf16.mxu0 %v1525_v24 }
 0x293   : > { %824 = vbcast.lane.b32.xlu1 %v768_v28, 280  ;;  %820 = vbcast.lane.b32.xlu0 %v768_v28, 272 }
 0x295   : > { %1270 = vmatpush3.bf16.msra.mxu0 %v1385_v34  ;;  %v999_v34 = vsel %vm997_vm14, %v985_v33, 0 }
 0x296   : > { %1271 = vmatprep.subr.bf16.mxu0 %v1525_v24  ;;  %1280 = vmatpush3.bf16.msra.mxu1 %v999_v34 }
 0x299   : > { %1272 = vmatpush3.bf16.msra.mxu0 %v1386_v35  ;;  %v1191_v35 = vld [vmem:[%s1873_s8] ss:$0 sm:$0xff] }
 0x29a   : > { %1273 = vmatprep.subr.bf16.mxu0 %v1525_v24 }
 0x29d   : > { %1274 = vmatpush3.bf16.msra.mxu0 %v1387_v36 }
 0x2f9   : > { %v771_v37 = vpop.permute.xlu1 %770  ;;  %v760_v38 = vpop.permute.xlu0 %759 }
 0x2fa   : > { %vm778_vm3 = vcmp.gt.f32.partialorder %v771_v37, 0.0  ;;  %vm776_vm4 = vcmp.gt.f32.partialorder %v760_v38, 0.0 }
 0x2fb   : > { %v790_v43 = vsel %vm778_vm3, %v751_v39, -1e+30  ;;  %v788_v44 = vsel %vm776_vm4, %v751_v39, -1e+30 }
 0x2fd   : > { %v775_v41 = vpop.permute.xlu1 %774  ;;  %v764_v42 = vpop.permute.xlu0 %763 }
 0x2fe   : > { %vm779_vm5 = vcmp.gt.f32.partialorder %v775_v41, 0.0  ;;  %vm777_vm6 = vcmp.gt.f32.partialorder %v764_v42, 0.0 }
 0x2ff   : > { %v791_v45 = vsel %vm779_vm5, %v752_v40, -1e+30  ;;  %v789_v46 = vsel %vm777_vm6, %v752_v40, -1e+30 }
 0x300   : > { %v799_v47 = vmax.f32 %v790_v43, %v791_v45  ;;  %v792_v48 = vmax.f32 %v788_v44, %v789_v46  ;;  %v1200_v43 = vld [vmem:[%s1875_s10] ss:$0 sm:$0xff] }
 0x301   : > { %v817_v51 = vpop.permute.xlu1 %816  ;;  %v813_v52 = vpop.permute.xlu0 %812 }
 0x302   : > { %v800_v53 = vrot.slane %v799_v47, 4  ;;  %v793_v54 = vrot.slane %v792_v48, 4  ;;  %vm827_vm7 = vcmp.gt.f32.partialorder %v817_v51, 0.0  ;;  %vm826_vm8 = vcmp.gt.f32.partialorder %v813_v52, 0.0 }
 0x303   : > { %v839_v55 = vsel %vm827_vm7, %v809_v49, -1e+30  ;;  %v838_v56 = vsel %vm826_vm8, %v808_v50, -1e+30 }
 0x304   : > { %v801_v57 = vmax.f32 %v799_v47, %v800_v53  ;;  %v794_v58 = vmax.f32 %v792_v48, %v793_v54  ;;  %v842_v59 = vmax.f32 %v838_v56, %v839_v55 }
 0x305   : > { %v825_v60 = vpop.permute.xlu1 %824  ;;  %v821_v61 = vpop.permute.xlu0 %820 }
 0x306   : > { %v802_v62 = vrot.slane %v801_v57, 2  ;;  %v795_v63 = vrot.slane %v794_v58, 2  ;;  %v843_v0 = vrot.slane %v842_v59, 4  ;;  %vm829_vm9 = vcmp.gt.f32.partialorder %v825_v60, 0.0 }
 0x307   : > { %v841_v1 = vsel %vm829_vm9, %v809_v49, -1e+30  ;;  %vm828_vm10 = vcmp.gt.f32.partialorder %v821_v61, 0.0 }
 0x308   : > { %v796_v2 = vmax.f32 %v794_v58, %v795_v63  ;;  %v844_v3 = vmax.f32 %v842_v59, %v843_v0  ;;  %v840_v4 = vsel %vm828_vm10, %v808_v50, -1e+30  ;;  %v803_v5 = vmax.f32 %v801_v57, %v802_v62 }
 0x309   : > { %v849_v6 = vmax.f32 %v840_v4, %v841_v1 }
 0x30a   : > { %v797_v7 = vrot.slane %v796_v2, 1  ;;  %v845_v8 = vrot.slane %v844_v3, 2  ;;  %v804_v12 = vrot.slane %v803_v5, 1 }
 0x30b   : > { %v850_v9 = vrot.slane %v849_v6, 4 }
 0x30c   : > { %v798_v10 = vmax.f32 %v796_v2, %v797_v7  ;;  %v846_v11 = vmax.f32 %v844_v3, %v845_v8  ;;  %v805_v18 = vmax.f32 %v803_v5, %v804_v12 }
 0x30d   : > { %v851_v13 = vmax.f32 %v849_v6, %v850_v9 }
 0x30e   : > { %v847_v14 = vrot.slane %v846_v11, 1  ;;  %v806_v16 = vmax.f32 %v798_v10, -1e+30  ;;  %v807_v22 = vmax.f32 %v805_v18, -1e+30 }
 0x30f   : > { %v852_v15 = vrot.slane %v851_v13, 2 }
 0x310   : > { %v848_v17 = vmax.f32 %v846_v11, %v847_v14 }
 0x311   : > { %v853_v19 = vmax.f32 %v851_v13, %v852_v15 }
 0x312   : > { %v856_v20 = vmax.f32 %v806_v16, %v848_v17 }
 0x313   : > { %v854_v21 = vrot.slane %v853_v19, 1 }
 0x314   : > { %vm858_vm11 = vcmp.gt.f32.partialorder %v856_v20, -5e+29 }
 0x315   : > { %v855_v23 = vmax.f32 %v853_v19, %v854_v21  ;;  %v860_v24 = vsel %vm858_vm11, %v856_v20, 0.0 }
 0x316   : > { %v862_v26 = vpack.c.bf16 %v860_v24, %v860_v24 }
 0x317   : > { %v857_v25 = vmax.f32 %v807_v22, %v855_v23 }
 0x318   : > { %v889_v29 = vunpack.c.l.b16 %v862_v26 }
 0x319   : > { %vm859_vm12 = vcmp.gt.f32.partialorder %v857_v25, -5e+29 }
 0x31a   : > { %v861_v27 = vsel %vm859_vm12, %v857_v25, 0.0 }
 0x31b   : > { %v863_v28 = vpack.c.bf16 %v861_v27, %v861_v27 }
 0x31d   : > { %v890_v30 = vunpack.c.l.b16 %v863_v28 }
 0x31f   : > { %v892_v31 = vsel %vm891_vm13, %v890_v30, %v889_v29 }
 0x320   : > { %v893_v32 = vpack.c.b16 %v892_v31, %v892_v31 }
 0x322   : > { %1276 = vmatmul.mubr.bf16.vlgmr.msra.gmra.mrb[0].mxu0 %v893_v32 }
 0x3f5   : > { %v977_v36 = vpop.f32.mrb[0].mxu0 }
 0x3f6   : > { %v978_v37 = vadd.f32 %v1191_v35, %v977_v36  ;;  %v1277_v38 = vpop.f32.mrb[1].mxu0 }
 0x3f7   : > { %v980_v39 = vpop.f32.mrb[2].mxu0 }
 0x3f8   : > { %v983_v40 = vmax.f32 %v978_v37, 0.0  ;;  %v1278_v41 = vpop.f32.mrb[3].mxu0 }
 0x3fa   : > { %v984_v42 = vpack.c.bf16 %v983_v40, %v983_v40 }
 0x3fc   : > { %1282 = vmatmul.mubr.msk.bf16.vlgmr.msra.gmra.mrb[0].mxu1 %vm993_vm15, %v984_v42 }
 0x4cf   : > { %v1035_v44 = vpop.f32.mrb[0].mxu1 }
 0x4d0   : > { %v1036_v45 = vadd.f32 %v1200_v43, %v1035_v44  ;;  %v1283_v46 = vpop.f32.mrb[1].mxu1 }
 0x4d1   : > { %v1038_v47 = vpop.f32.mrb[2].mxu1 }
 0x4d2   : > { %v1041_v48 = vmax.f32 %v1036_v45, 0.0  ;;  %v1284_v49 = vpop.f32.mrb[3].mxu1 }
 0x4d4   : > { %v1043_v50 = vsel %vm1042_vm0, %v1041_v48, -inf }
 0x4d5   : > { %1044 = vmax.xlane.f32.xlu0 %v1043_v50 }
 0x562   : > { %v1045_v51 = vpop.xlane.xlu0 %1044 }
 0x563   : > { %v1046_v52 = vsub.f32 %v1041_v48, %v1045_v51 }
 0x565   : > { %v1047_v53 = vmul.f32 1.442695, %v1046_v52 }
 0x567   : > { %1388 = vpow2.f32 %v1047_v53 }
 0x571   : > { %v1389_v54 = vpop.eup %1388 }
 0x572   : > { %v1049_v55 = vsel %vm1042_vm0, %v1389_v54, 0.0 }
 0x573   : > { %1050 = vadd.xlane.f32.xlu1 %v1049_v55 }
 0x600   : > { %v1051_v56 = vpop.xlane.xlu1 %1050 }
 0x601   : > { %1390 = vrcp.f32 %v1051_v56 }
 0x60b   : > { %v1391_v57 = vpop.eup %1390 }
 0x60c   : > { %v1053_v58 = vmul.f32 %v1391_v57, %v1389_v54 }
 0x60e   : > { %1054 = vst.msk [vmem:[#allocation7] sm:$0x3] %vm1042_vm0, %v1053_v58 }
 0x60f PF: > { %s1895_s21 = sadd.s32 4294967295, %s1518_s24   ;;  %s1527_s11 = smov [#allocation7]  }
 0x610   : > { %p1815_p3 = scmp.eq.s32.totalorder %s1895_s21, 3  ;;  %s1062_s29 = sshll.u32 %s1527_s11, 4  ;;  %s1063_s29 = int_to_ptr.vmem [resolvable:$true] %s1062_s29 }
 0x611   : > { %s1422_s3 = scalar_lea.vmem %s1063_s29, 32  ;;  %p1429_p10 = scmp.lt.s32.totalorder %s1063_s29, %s1063_s29 }
 0x612   : > { %p1423_p12 = scmp.ne.s32.totalorder %s1063_s29, %s1422_s3  ;;  %p1430_p5 = scmp.lt.s32.totalorder %s1422_s3, %s1422_s3 }
 0x614   : > { %p1424_p0 = pnand %p1423_p12, %p1815_p3  ;;  %p1431_p6 = por %p1430_p5, %p1429_p10 }
 0x616   : > { %p1425_p4 = pneg %p1424_p0 }
 0x618   : > { %p1432_p7 = pnand %p1431_p6, %p1425_p4 }
 0x61a   : > { %1435 = shalt.err (!%p1432_p7)
}
 0x61b   : > { %s1897_s17 = sld [smem:[#allocation17_spill]] }
 0x621   : > { %s1898_s12 = smov %s1897_s17  ;;  %s1436_s14 = scalar_lea.hbm %s1897_s17, 32 }
 0x622   : > { %p1437_p8 = scmp.ne.s32.totalorder %s1898_s12, %s1436_s14  ;;  %p1442_p13 = scmp.lt.u32.totalorder %s1436_s14, %s1898_s12 }
 0x624   : > { %p1438_p9 = pnand %p1437_p8, %p1815_p3 }
 0x626   : > { %p1439_p11 = pneg %p1438_p9 }
 0x628   : > { %p1444_p1 = pnand %p1442_p13, %p1439_p11 }
 0x62a   : > { %1447 = shalt.err (!%p1444_p1)
}
 0x62b   : > { %1288 = dma.vmem_to_hbm [thread:$0]  (%p1815_p3), %s1063_s29, 32, %s1898_s12, [#allocation6]  }
 0x62c   : > { %1485 = dma.done.wait (%p1815_p3), [#allocation6], 32  }
 0x62d   : > { %1487 = vsyncadd (%p1815_p3), [#allocation6], 4294967264 }
 0x62e PF: > { %s25_s24 = sadd.s32 1, %s1518_s24   ;;  %s1899_s13 = sld [smem:[#allocation10_spill]] }
 0x62f   : > { %p22_p2 = scmp.ge.s32.totalorder %s25_s24, 6   ;;  %s1900_s19 = sld [smem:[#allocation15_spill]] }
 0x630   : > { %s1901_s20 = sld [smem:[#allocation11_spill]]  ;;  %s1902_s21 = sld [smem:[#allocation12_spill]] }
 0x631   : > { %s1903_s22 = sld [smem:[#allocation13_spill]]  ;;  %s1904_s23 = sld [smem:[#allocation14_spill]] }
 0x632   : > { %s1905_s17 = smov %s1494_s18  ;;  %24 = sbr.rel (!%p22_p2) target bundleno = 9 (0x9), region = 130 }
 0x634   : > { %s1906_s18 = smov %s1899_s13 }
 0x639   :  { %1075 = vsyncpa [#allocation5], 1 }
 0x63a   :  { %1077 = vsyncpa [#allocation5 + $0x1], 1 }
 0x63b   :  { %1078 = vsyncpa [#allocation6], 1 }
 0x63c   :  { %1080 = vsyncpa [#allocation6 + $0x1], 1 }

</bundles_post_ra>
